<compile_context>
chip_gen: v5e
topology: v5e:2x2
jax: 0.10.0
libtpu: 0.0.40
codegen_flags: <defaults>
</compile_context>

<pallas_src>
import math

import jax
import jax.numpy as jnp
from jax import lax
from jax.experimental import pallas as pl
from jax.experimental.pallas import tpu as pltpu

# ---------------- problem sizes (small, consistent with the module) ----------
B = 2          # batch
S = 8          # seq length
D = 32         # d_model
H = 4          # num_heads
DK = D // H    # d_k per head
DFF = 64       # d_ff
BS = B * S     # folded batch*seq rows
LN_EPS = 1e-5  # PyTorch nn.LayerNorm default
NEG_INF = -1e9 # matches masked_fill(mask == 0, -1e9)

# ---- packed-parameter slab layout (keep _pack_params and kernel in sync) ----
W_COLS = 4 * D + 2 * DFF          # 256 lanes: [Wq|Wk|Wv|Wo|W1|W2^T]
COL_WQKV = 0                      # cols [0, 3D)     : Wq|Wk|Wv
COL_WO = 3 * D                    # cols [3D, 4D)    : Wo
COL_W1 = 4 * D                    # cols [4D, 4D+DFF): W1
COL_W2T = 4 * D + DFF             # cols [4D+DFF, ..): W2^T  (stored (D, DFF))
PV_ROWS = 8                       # vector rows appended below the D weight rows
(ROW_BQKV, ROW_BO, ROW_B1, ROW_B2, ROW_G1, ROW_BE1, ROW_G2, ROW_BE2) = range(8)

# contract the LAST dims of both operands (i.e. a @ b^T without materializing b^T)
_DN_TRANS_B = (((1,), (1,)), ((), ()))


def _layernorm(x, gamma, beta):
    # x: (BS, D); gamma/beta: (1, D)
    mu = jnp.mean(x, axis=-1, keepdims=True)
    xc = x - mu
    var = jnp.mean(xc * xc, axis=-1, keepdims=True)
    return xc * lax.rsqrt(var + LN_EPS) * gamma + beta


def encoder_layer_kernel(x_ref, bias_ref, params_ref, out_ref):
    x = x_ref[...]                                         # (BS, D)
    bias = bias_ref[...]                                   # (BS, BS) additive mask bias
    params = params_ref[...]                               # (D + 8, W_COLS)

    w = params[:D]                                         # (D, W_COLS)
    w_qkv = w[:, COL_WQKV:COL_WO]                          # (D, 3D)
    w_o = w[:, COL_WO:COL_W1]                              # (D, D)
    w_1 = w[:, COL_W1:COL_W2T]                             # (D, DFF)
    w_2t = w[:, COL_W2T:]                                  # (D, DFF) == W2^T

    pv = params[D:D + PV_ROWS]                             # (8, W_COLS)
    b_qkv = pv[ROW_BQKV:ROW_BQKV + 1, :3 * D]
    b_o = pv[ROW_BO:ROW_BO + 1, :D]
    b_1 = pv[ROW_B1:ROW_B1 + 1, :DFF]
    b_2 = pv[ROW_B2:ROW_B2 + 1, :D]
    g1, be1 = pv[ROW_G1:ROW_G1 + 1, :D], pv[ROW_BE1:ROW_BE1 + 1, :D]
    g2, be2 = pv[ROW_G2:ROW_G2 + 1, :D], pv[ROW_BE2:ROW_BE2 + 1, :D]

    # ---- fused Q/K/V projection: one MXU launch over all B*S rows -----------
    qkv = jnp.dot(x, w_qkv, preferred_element_type=jnp.float32) + b_qkv   # (BS, 3D)

    # ---- multi-head self-attention, batch folded; Wo folded per head --------
    # Cross-batch score entries are masked by `bias` (-1e9), so the softmax is
    # effectively per-batch.  Note: a row that is FULLY masked within its own
    # batch would normalize over all BS columns instead of S (both degenerate
    # uniform cases); the test mask has no fully-masked rows.
    scale = 1.0 / math.sqrt(DK)
    attn = None
    for h in range(H):                                     # static unroll, H = 4
        lo = h * DK
        q_h = qkv[:, lo:lo + DK]                           # (BS, DK)
        k_h = qkv[:, D + lo:D + lo + DK]
        v_h = qkv[:, 2 * D + lo:2 * D + lo + DK]
        # q @ k^T via transposed contraction -> no XLU transpose materialized
        s_h = lax.dot_general(q_h, k_h, _DN_TRANS_B,
                              preferred_element_type=jnp.float32) * scale
        s_h = s_h + bias                                   # (BS, BS)
        m_h = jnp.max(s_h, axis=-1, keepdims=True)
        e_h = jnp.exp(s_h - m_h)
        p_h = e_h / jnp.sum(e_h, axis=-1, keepdims=True)   # exact division
        ctx_h = jnp.dot(p_h, v_h, preferred_element_type=jnp.float32)     # (BS, DK)
        o_h = jnp.dot(ctx_h, w_o[lo:lo + DK, :],           # fold Wo: no concat
                      preferred_element_type=jnp.float32)  # (BS, D)
        attn = o_h if attn is None else attn + o_h         # VPU adds (MRB on v7x TODO)
    attn = attn + b_o

    # ---- residual + LayerNorm 1 (dropout == identity) ------------------------
    x1 = _layernorm(x + attn, g1, be1)

    # ---- position-wise feed forward ------------------------------------------
    h1 = jnp.dot(x1, w_1, preferred_element_type=jnp.float32) + b_1
    h1 = jnp.maximum(h1, 0.0)
    ff = lax.dot_general(h1, w_2t, _DN_TRANS_B,            # h1 @ W2 via trans_b
                         preferred_element_type=jnp.float32) + b_2

    # ---- residual + LayerNorm 2 -----------------------------------------------
    out_ref[...] = _layernorm(x1 + ff, g2, be2).astype(out_ref.dtype)


def _pack_params(params):
    """Pack the 16 module parameters into ONE (D+8, W_COLS) slab.

    In a real model this packing would be done once at load time; here it is a
    few tiny XLA ops outside the kernel.
    """
    (wq, bq, wk, bk, wv, bv, wo, bo, w1, b1, w2, b2, g1, be1, g2, be2) = params
    w_slab = jnp.concatenate([wq, wk, wv, wo, w1, w2.T], axis=1)
    assert w_slab.shape == (D, W_COLS), w_slab.shape
    rows = [
        jnp.concatenate([bq, bk, bv], axis=1),             # (1, 3D) row ROW_BQKV
        bo, b1, b2, g1, be1, g2, be2,
    ]
    assert len(rows) == PV_ROWS
    pvec = jnp.zeros((PV_ROWS, W_COLS), jnp.float32)
    for i, r in enumerate(rows):
        assert r.ndim == 2 and r.shape[0] == 1 and r.shape[1] <= W_COLS, r.shape
        pvec = pvec.at[i, : r.shape[-1]].set(r[0])
    return jnp.concatenate([w_slab, pvec], axis=0)         # (D + 8, W_COLS)


def _attn_bias(mask):
    """(B, S, S) mask -> (B*S, B*S) additive bias.

    0 where attention is allowed (same batch & mask != 0), NEG_INF elsewhere
    (masked positions AND cross-batch entries of the folded score matrix).
    Built outside the kernel: removes the in-kernel compare/select and the
    per-step (B,S,S) mask DMA.
    """
    in_bias = jnp.where(mask == 0, NEG_INF, 0.0).astype(jnp.float32)       # (B,S,S)
    same_batch = jnp.eye(B, dtype=bool)[:, None, :, None]                  # (B,1,B,1)
    bias4 = jnp.where(same_batch, in_bias[:, :, None, :], NEG_INF)         # (B,S,B,S)
    return bias4.reshape(BS, BS)


def encoder_layer(x, mask, params):
    """x: (B, S, D) float32; mask: (B, S, S) (0 => masked)."""
    params_slab = _pack_params(params)                     # (D+8, W_COLS)
    x2d = x.reshape(BS, D)
    bias = _attn_bias(mask)

    flops = (2 * BS * D * 3 * D                            # QKV projection
             + H * (2 * BS * BS * DK) * 2                  # scores + ctx
             + H * 2 * BS * DK * D                         # per-head Wo
             + 2 * (2 * BS * D * DFF))                     # FFN
    transcendentals = H * BS * BS + 2 * BS                 # exp + rsqrt
    bytes_accessed = 4 * (BS * D + BS * BS + (D + PV_ROWS) * W_COLS + BS * D)

    out2d = pl.pallas_call(
        encoder_layer_kernel,
        out_shape=jax.ShapeDtypeStruct((BS, D), jnp.float32),
        grid=(1,),                                         # single step, B folded
        in_specs=[
            pl.BlockSpec((BS, D), lambda i: (0, 0)),       # x (folded batch)
            pl.BlockSpec((BS, BS), lambda i: (0, 0)),      # additive attn bias
            pl.BlockSpec((D + PV_ROWS, W_COLS), lambda i: (0, 0)),  # packed params
        ],
        out_specs=pl.BlockSpec((BS, D), lambda i: (0, 0)),
        compiler_params=pltpu.CompilerParams(
            dimension_semantics=("arbitrary",)),
        cost_estimate=pl.CostEstimate(flops=flops,
                                      transcendentals=transcendentals,
                                      bytes_accessed=bytes_accessed),
    )(x2d, bias, params_slab)
    return out2d.reshape(B, S, D)


# ---------------- pure-JAX reference for a correctness check -----------------
def encoder_layer_ref(x, mask, params):
    (wq, bq, wk, bk, wv, bv, wo, bo, w1, b1, w2, b2, g1, be1, g2, be2) = params

    def ln(z, g, b):
        mu = jnp.mean(z, axis=-1, keepdims=True)
        var = jnp.mean((z - mu) ** 2, axis=-1, keepdims=True)
        return (z - mu) / jnp.sqrt(var + LN_EPS) * g + b

    q = x @ wq + bq
    k = x @ wk + bk
    v = x @ wv + bv
    def split(t):  # (B,S,D) -> (B,H,S,DK)
        return t.reshape(B, S, H, DK).transpose(0, 2, 1, 3)
    qh, kh, vh = split(q), split(k), split(v)
    scores = jnp.einsum('bhqd,bhkd->bhqk', qh, kh) / math.sqrt(DK)
    scores = jnp.where(mask[:, None, :, :] == 0.0, NEG_INF, scores)
    probs = jax.nn.softmax(scores, axis=-1)
    attn = jnp.einsum('bhqk,bhkd->bhqd', probs, vh)
    attn = attn.transpose(0, 2, 1, 3).reshape(B, S, D) @ wo + bo
    x1 = ln(x + attn, g1, be1)
    ff = jnp.maximum(x1 @ w1 + b1, 0.0) @ w2 + b2
    return ln(x1 + ff, g2, be2)


if __name__ == "__main__":
    key = jax.random.PRNGKey(0)
    keys = jax.random.split(key, 20)

    def init_linear(kw, kb, fan_in, fan_out):
        # deterministic, roughly PyTorch-Linear-like uniform init
        bound = 1.0 / math.sqrt(fan_in)
        w = jax.random.uniform(kw, (fan_in, fan_out), jnp.float32, -bound, bound)
        b = jax.random.uniform(kb, (1, fan_out), jnp.float32, -bound, bound)
        return w, b

    wq, bq = init_linear(keys[0], keys[1], D, D)
    wk, bk = init_linear(keys[2], keys[3], D, D)
    wv, bv = init_linear(keys[4], keys[5], D, D)
    wo, bo = init_linear(keys[6], keys[7], D, D)
    w1, b1 = init_linear(keys[8], keys[9], D, DFF)
    w2, b2 = init_linear(keys[10], keys[11], DFF, D)
    g1 = jnp.ones((1, D), jnp.float32)
    be1 = jnp.zeros((1, D), jnp.float32)
    g2 = jnp.ones((1, D), jnp.float32)
    be2 = jnp.zeros((1, D), jnp.float32)
    params = (wq, bq, wk, bk, wv, bv, wo, bo, w1, b1, w2, b2, g1, be1, g2, be2)

    x = jax.random.normal(keys[12], (B, S, D), jnp.float32)
    # padding-style mask: 0 => masked position (broadcast over heads)
    key_lens = jnp.array([S, S - 2])
    mask = (jnp.arange(S)[None, :] < key_lens[:, None]).astype(jnp.float32)  # (B, S)
    mask = jnp.broadcast_to(mask[:, None, :], (B, S, S))                      # (B, S, S)

    out = encoder_layer(x, mask, params)
    out = jax.block_until_ready(out)

    ref = encoder_layer_ref(x, mask, params)
    # Exact softmax division restored -> tight tolerance again.
    assert jnp.allclose(out, ref, atol=1e-4, rtol=1e-4), "mismatch vs reference"

    # TODO(synk): dropout is treated as identity (inference semantics); stochastic
    # training-mode dropout would use pltpu.prng_seed / prng_random_bits.
    print("KERNEL_OK")
</pallas_src>

<mosaic_0001>
module attributes {stable_mosaic.version = 11 : i64} {
  func.func @encoder_layer_kernel(%arg0: i32, %arg1: memref<16x32xf32, #tpu.memory_space<vmem>>, %arg2: memref<16x16xf32, #tpu.memory_space<vmem>>, %arg3: memref<40x256xf32, #tpu.memory_space<vmem>>, %arg4: memref<16x32xf32, #tpu.memory_space<vmem>>) attributes {dimension_semantics = [#tpu.dimension_semantics<arbitrary>], iteration_bounds = array<i64: 1>, scalar_prefetch = 0 : i64, scratch_operands = 0 : i64, tpu.core_type = #tpu.core_type<tc>, window_params = [{pipeline_mode = #tpu.pipeline_mode<synchronous>, transform_indices = @transform_0, window_bounds = array<i64: 16, 32>}, {pipeline_mode = #tpu.pipeline_mode<synchronous>, transform_indices = @transform_1, window_bounds = array<i64: 16, 16>}, {pipeline_mode = #tpu.pipeline_mode<synchronous>, transform_indices = @transform_2, window_bounds = array<i64: 40, 256>}, {pipeline_mode = #tpu.pipeline_mode<synchronous>, transform_indices = @transform_3, window_bounds = array<i64: 16, 32>}]} {
    %c0 = arith.constant 0 : index
    %c0_0 = arith.constant 0 : index
    %0 = vector.load %arg1[%c0, %c0_0] : memref<16x32xf32, #tpu.memory_space<vmem>>, vector<16x32xf32>
    %c0_1 = arith.constant 0 : index
    %c0_2 = arith.constant 0 : index
    %1 = vector.load %arg2[%c0_1, %c0_2] : memref<16x16xf32, #tpu.memory_space<vmem>>, vector<16x16xf32>
    %c0_3 = arith.constant 0 : index
    %c0_4 = arith.constant 0 : index
    %2 = vector.load %arg3[%c0_3, %c0_4] : memref<40x256xf32, #tpu.memory_space<vmem>>, vector<40x256xf32>
    %3 = vector.extract_strided_slice %2 {offsets = [0, 0], sizes = [32, 256], strides = [1, 1]} : vector<40x256xf32> to vector<32x256xf32>
    %4 = vector.extract_strided_slice %3 {offsets = [0, 0], sizes = [32, 96], strides = [1, 1]} : vector<32x256xf32> to vector<32x96xf32>
    %5 = vector.extract_strided_slice %3 {offsets = [0, 96], sizes = [32, 32], strides = [1, 1]} : vector<32x256xf32> to vector<32x32xf32>
    %6 = vector.extract_strided_slice %3 {offsets = [0, 128], sizes = [32, 64], strides = [1, 1]} : vector<32x256xf32> to vector<32x64xf32>
    %7 = vector.extract_strided_slice %3 {offsets = [0, 192], sizes = [32, 64], strides = [1, 1]} : vector<32x256xf32> to vector<32x64xf32>
    %8 = vector.extract_strided_slice %2 {offsets = [32, 0], sizes = [8, 256], strides = [1, 1]} : vector<40x256xf32> to vector<8x256xf32>
    %9 = vector.extract_strided_slice %8 {offsets = [0, 0], sizes = [1, 96], strides = [1, 1]} : vector<8x256xf32> to vector<1x96xf32>
    %10 = vector.extract_strided_slice %8 {offsets = [1, 0], sizes = [1, 32], strides = [1, 1]} : vector<8x256xf32> to vector<1x32xf32>
    %11 = vector.extract_strided_slice %8 {offsets = [2, 0], sizes = [1, 64], strides = [1, 1]} : vector<8x256xf32> to vector<1x64xf32>
    %12 = vector.extract_strided_slice %8 {offsets = [3, 0], sizes = [1, 32], strides = [1, 1]} : vector<8x256xf32> to vector<1x32xf32>
    %13 = vector.extract_strided_slice %8 {offsets = [4, 0], sizes = [1, 32], strides = [1, 1]} : vector<8x256xf32> to vector<1x32xf32>
    %14 = vector.extract_strided_slice %8 {offsets = [5, 0], sizes = [1, 32], strides = [1, 1]} : vector<8x256xf32> to vector<1x32xf32>
    %15 = vector.extract_strided_slice %8 {offsets = [6, 0], sizes = [1, 32], strides = [1, 1]} : vector<8x256xf32> to vector<1x32xf32>
    %16 = vector.extract_strided_slice %8 {offsets = [7, 0], sizes = [1, 32], strides = [1, 1]} : vector<8x256xf32> to vector<1x32xf32>
    %cst = arith.constant dense<0.000000e+00> : vector<16x96xf32>
    %17 = tpu.matmul %0, %4, %cst {dimension_numbers = #tpu.dot_dimension_numbers<[1], [0], [0], [1], [0, 0, 1, 1], [], []>} : vector<16x32xf32>, vector<32x96xf32>, vector<16x96xf32> -> vector<16x96xf32>
    %18 = vector.broadcast %9 : vector<1x96xf32> to vector<16x96xf32>
    %19 = arith.addf %17, %18 : vector<16x96xf32>
    %20 = vector.extract_strided_slice %19 {offsets = [0, 0], sizes = [16, 8], strides = [1, 1]} : vector<16x96xf32> to vector<16x8xf32>
    %21 = vector.extract_strided_slice %19 {offsets = [0, 32], sizes = [16, 8], strides = [1, 1]} : vector<16x96xf32> to vector<16x8xf32>
    %22 = vector.extract_strided_slice %19 {offsets = [0, 64], sizes = [16, 8], strides = [1, 1]} : vector<16x96xf32> to vector<16x8xf32>
    %cst_5 = arith.constant dense<0.000000e+00> : vector<16x16xf32>
    %23 = tpu.matmul %20, %21, %cst_5 {dimension_numbers = #tpu.dot_dimension_numbers<[1], [1], [0], [0], [0, 0, 1, 0], [], []>} : vector<16x8xf32>, vector<16x8xf32>, vector<16x16xf32> -> vector<16x16xf32>
    %cst_6 = arith.constant 0.353553385 : f32
    %24 = vector.broadcast %cst_6 : f32 to vector<16x16xf32>
    %25 = arith.mulf %23, %24 : vector<16x16xf32>
    %26 = arith.addf %25, %1 : vector<16x16xf32>
    %cst_7 = arith.constant dense<0xFF800000> : vector<16xf32>
    %27 = vector.multi_reduction <maximumf>, %26, %cst_7 [1] : vector<16x16xf32> to vector<16xf32>
    %28 = vector.shape_cast %27 : vector<16xf32> to vector<16x1xf32>
    %29 = vector.broadcast %28 : vector<16x1xf32> to vector<16x16xf32>
    %30 = arith.subf %26, %29 : vector<16x16xf32>
    %31 = math.exp %30 : vector<16x16xf32>
    %cst_8 = arith.constant dense<0.000000e+00> : vector<16xf32>
    %32 = vector.multi_reduction <add>, %31, %cst_8 [1] : vector<16x16xf32> to vector<16xf32>
    %33 = vector.shape_cast %32 : vector<16xf32> to vector<16x1xf32>
    %34 = vector.broadcast %33 : vector<16x1xf32> to vector<16x16xf32>
    %35 = arith.divf %31, %34 : vector<16x16xf32>
    %cst_9 = arith.constant dense<0.000000e+00> : vector<16x8xf32>
    %36 = tpu.matmul %35, %22, %cst_9 {dimension_numbers = #tpu.dot_dimension_numbers<[1], [0], [0], [1], [0, 0, 1, 1], [], []>} : vector<16x16xf32>, vector<16x8xf32>, vector<16x8xf32> -> vector<16x8xf32>
    %37 = vector.extract_strided_slice %5 {offsets = [0, 0], sizes = [8, 32], strides = [1, 1]} : vector<32x32xf32> to vector<8x32xf32>
    %cst_10 = arith.constant dense<0.000000e+00> : vector<16x32xf32>
    %38 = tpu.matmul %36, %37, %cst_10 {dimension_numbers = #tpu.dot_dimension_numbers<[1], [0], [0], [1], [0, 0, 1, 1], [], []>} : vector<16x8xf32>, vector<8x32xf32>, vector<16x32xf32> -> vector<16x32xf32>
    %39 = vector.extract_strided_slice %19 {offsets = [0, 8], sizes = [16, 8], strides = [1, 1]} : vector<16x96xf32> to vector<16x8xf32>
    %40 = vector.extract_strided_slice %19 {offsets = [0, 40], sizes = [16, 8], strides = [1, 1]} : vector<16x96xf32> to vector<16x8xf32>
    %41 = vector.extract_strided_slice %19 {offsets = [0, 72], sizes = [16, 8], strides = [1, 1]} : vector<16x96xf32> to vector<16x8xf32>
    %cst_11 = arith.constant dense<0.000000e+00> : vector<16x16xf32>
    %42 = tpu.matmul %39, %40, %cst_11 {dimension_numbers = #tpu.dot_dimension_numbers<[1], [1], [0], [0], [0, 0, 1, 0], [], []>} : vector<16x8xf32>, vector<16x8xf32>, vector<16x16xf32> -> vector<16x16xf32>
    %cst_12 = arith.constant 0.353553385 : f32
    %43 = vector.broadcast %cst_12 : f32 to vector<16x16xf32>
    %44 = arith.mulf %42, %43 : vector<16x16xf32>
    %45 = arith.addf %44, %1 : vector<16x16xf32>
    %cst_13 = arith.constant dense<0xFF800000> : vector<16xf32>
    %46 = vector.multi_reduction <maximumf>, %45, %cst_13 [1] : vector<16x16xf32> to vector<16xf32>
    %47 = vector.shape_cast %46 : vector<16xf32> to vector<16x1xf32>
    %48 = vector.broadcast %47 : vector<16x1xf32> to vector<16x16xf32>
    %49 = arith.subf %45, %48 : vector<16x16xf32>
    %50 = math.exp %49 : vector<16x16xf32>
    %cst_14 = arith.constant dense<0.000000e+00> : vector<16xf32>
    %51 = vector.multi_reduction <add>, %50, %cst_14 [1] : vector<16x16xf32> to vector<16xf32>
    %52 = vector.shape_cast %51 : vector<16xf32> to vector<16x1xf32>
    %53 = vector.broadcast %52 : vector<16x1xf32> to vector<16x16xf32>
    %54 = arith.divf %50, %53 : vector<16x16xf32>
    %cst_15 = arith.constant dense<0.000000e+00> : vector<16x8xf32>
    %55 = tpu.matmul %54, %41, %cst_15 {dimension_numbers = #tpu.dot_dimension_numbers<[1], [0], [0], [1], [0, 0, 1, 1], [], []>} : vector<16x16xf32>, vector<16x8xf32>, vector<16x8xf32> -> vector<16x8xf32>
    %56 = vector.extract_strided_slice %5 {offsets = [8, 0], sizes = [8, 32], strides = [1, 1]} : vector<32x32xf32> to vector<8x32xf32>
    %cst_16 = arith.constant dense<0.000000e+00> : vector<16x32xf32>
    %57 = tpu.matmul %55, %56, %cst_16 {dimension_numbers = #tpu.dot_dimension_numbers<[1], [0], [0], [1], [0, 0, 1, 1], [], []>} : vector<16x8xf32>, vector<8x32xf32>, vector<16x32xf32> -> vector<16x32xf32>
    %58 = arith.addf %38, %57 : vector<16x32xf32>
    %59 = vector.extract_strided_slice %19 {offsets = [0, 16], sizes = [16, 8], strides = [1, 1]} : vector<16x96xf32> to vector<16x8xf32>
    %60 = vector.extract_strided_slice %19 {offsets = [0, 48], sizes = [16, 8], strides = [1, 1]} : vector<16x96xf32> to vector<16x8xf32>
    %61 = vector.extract_strided_slice %19 {offsets = [0, 80], sizes = [16, 8], strides = [1, 1]} : vector<16x96xf32> to vector<16x8xf32>
    %cst_17 = arith.constant dense<0.000000e+00> : vector<16x16xf32>
    %62 = tpu.matmul %59, %60, %cst_17 {dimension_numbers = #tpu.dot_dimension_numbers<[1], [1], [0], [0], [0, 0, 1, 0], [], []>} : vector<16x8xf32>, vector<16x8xf32>, vector<16x16xf32> -> vector<16x16xf32>
    %cst_18 = arith.constant 0.353553385 : f32
    %63 = vector.broadcast %cst_18 : f32 to vector<16x16xf32>
    %64 = arith.mulf %62, %63 : vector<16x16xf32>
    %65 = arith.addf %64, %1 : vector<16x16xf32>
    %cst_19 = arith.constant dense<0xFF800000> : vector<16xf32>
    %66 = vector.multi_reduction <maximumf>, %65, %cst_19 [1] : vector<16x16xf32> to vector<16xf32>
    %67 = vector.shape_cast %66 : vector<16xf32> to vector<16x1xf32>
    %68 = vector.broadcast %67 : vector<16x1xf32> to vector<16x16xf32>
    %69 = arith.subf %65, %68 : vector<16x16xf32>
    %70 = math.exp %69 : vector<16x16xf32>
    %cst_20 = arith.constant dense<0.000000e+00> : vector<16xf32>
    %71 = vector.multi_reduction <add>, %70, %cst_20 [1] : vector<16x16xf32> to vector<16xf32>
    %72 = vector.shape_cast %71 : vector<16xf32> to vector<16x1xf32>
    %73 = vector.broadcast %72 : vector<16x1xf32> to vector<16x16xf32>
    %74 = arith.divf %70, %73 : vector<16x16xf32>
    %cst_21 = arith.constant dense<0.000000e+00> : vector<16x8xf32>
    %75 = tpu.matmul %74, %61, %cst_21 {dimension_numbers = #tpu.dot_dimension_numbers<[1], [0], [0], [1], [0, 0, 1, 1], [], []>} : vector<16x16xf32>, vector<16x8xf32>, vector<16x8xf32> -> vector<16x8xf32>
    %76 = vector.extract_strided_slice %5 {offsets = [16, 0], sizes = [8, 32], strides = [1, 1]} : vector<32x32xf32> to vector<8x32xf32>
    %cst_22 = arith.constant dense<0.000000e+00> : vector<16x32xf32>
    %77 = tpu.matmul %75, %76, %cst_22 {dimension_numbers = #tpu.dot_dimension_numbers<[1], [0], [0], [1], [0, 0, 1, 1], [], []>} : vector<16x8xf32>, vector<8x32xf32>, vector<16x32xf32> -> vector<16x32xf32>
    %78 = arith.addf %58, %77 : vector<16x32xf32>
    %79 = vector.extract_strided_slice %19 {offsets = [0, 24], sizes = [16, 8], strides = [1, 1]} : vector<16x96xf32> to vector<16x8xf32>
    %80 = vector.extract_strided_slice %19 {offsets = [0, 56], sizes = [16, 8], strides = [1, 1]} : vector<16x96xf32> to vector<16x8xf32>
    %81 = vector.extract_strided_slice %19 {offsets = [0, 88], sizes = [16, 8], strides = [1, 1]} : vector<16x96xf32> to vector<16x8xf32>
    %cst_23 = arith.constant dense<0.000000e+00> : vector<16x16xf32>
    %82 = tpu.matmul %79, %80, %cst_23 {dimension_numbers = #tpu.dot_dimension_numbers<[1], [1], [0], [0], [0, 0, 1, 0], [], []>} : vector<16x8xf32>, vector<16x8xf32>, vector<16x16xf32> -> vector<16x16xf32>
    %cst_24 = arith.constant 0.353553385 : f32
    %83 = vector.broadcast %cst_24 : f32 to vector<16x16xf32>
    %84 = arith.mulf %82, %83 : vector<16x16xf32>
    %85 = arith.addf %84, %1 : vector<16x16xf32>
    %cst_25 = arith.constant dense<0xFF800000> : vector<16xf32>
    %86 = vector.multi_reduction <maximumf>, %85, %cst_25 [1] : vector<16x16xf32> to vector<16xf32>
    %87 = vector.shape_cast %86 : vector<16xf32> to vector<16x1xf32>
    %88 = vector.broadcast %87 : vector<16x1xf32> to vector<16x16xf32>
    %89 = arith.subf %85, %88 : vector<16x16xf32>
    %90 = math.exp %89 : vector<16x16xf32>
    %cst_26 = arith.constant dense<0.000000e+00> : vector<16xf32>
    %91 = vector.multi_reduction <add>, %90, %cst_26 [1] : vector<16x16xf32> to vector<16xf32>
    %92 = vector.shape_cast %91 : vector<16xf32> to vector<16x1xf32>
    %93 = vector.broadcast %92 : vector<16x1xf32> to vector<16x16xf32>
    %94 = arith.divf %90, %93 : vector<16x16xf32>
    %cst_27 = arith.constant dense<0.000000e+00> : vector<16x8xf32>
    %95 = tpu.matmul %94, %81, %cst_27 {dimension_numbers = #tpu.dot_dimension_numbers<[1], [0], [0], [1], [0, 0, 1, 1], [], []>} : vector<16x16xf32>, vector<16x8xf32>, vector<16x8xf32> -> vector<16x8xf32>
    %96 = vector.extract_strided_slice %5 {offsets = [24, 0], sizes = [8, 32], strides = [1, 1]} : vector<32x32xf32> to vector<8x32xf32>
    %cst_28 = arith.constant dense<0.000000e+00> : vector<16x32xf32>
    %97 = tpu.matmul %95, %96, %cst_28 {dimension_numbers = #tpu.dot_dimension_numbers<[1], [0], [0], [1], [0, 0, 1, 1], [], []>} : vector<16x8xf32>, vector<8x32xf32>, vector<16x32xf32> -> vector<16x32xf32>
    %98 = arith.addf %78, %97 : vector<16x32xf32>
    %99 = vector.broadcast %10 : vector<1x32xf32> to vector<16x32xf32>
    %100 = arith.addf %98, %99 : vector<16x32xf32>
    %101 = arith.addf %0, %100 : vector<16x32xf32>
    %cst_29 = arith.constant dense<0.000000e+00> : vector<16xf32>
    %102 = vector.multi_reduction <add>, %101, %cst_29 [1] : vector<16x32xf32> to vector<16xf32>
    %103 = vector.shape_cast %102 : vector<16xf32> to vector<16x1xf32>
    %cst_30 = arith.constant 3.200000e+01 : f32
    %104 = vector.broadcast %cst_30 : f32 to vector<16x1xf32>
    %105 = arith.divf %103, %104 : vector<16x1xf32>
    %106 = vector.broadcast %105 : vector<16x1xf32> to vector<16x32xf32>
    %107 = arith.subf %101, %106 : vector<16x32xf32>
    %108 = arith.mulf %107, %107 : vector<16x32xf32>
    %cst_31 = arith.constant dense<0.000000e+00> : vector<16xf32>
    %109 = vector.multi_reduction <add>, %108, %cst_31 [1] : vector<16x32xf32> to vector<16xf32>
    %110 = vector.shape_cast %109 : vector<16xf32> to vector<16x1xf32>
    %cst_32 = arith.constant 3.200000e+01 : f32
    %111 = vector.broadcast %cst_32 : f32 to vector<16x1xf32>
    %112 = arith.divf %110, %111 : vector<16x1xf32>
    %cst_33 = arith.constant 9.99999974E-6 : f32
    %113 = vector.broadcast %cst_33 : f32 to vector<16x1xf32>
    %114 = arith.addf %112, %113 : vector<16x1xf32>
    %115 = math.rsqrt %114 : vector<16x1xf32>
    %116 = vector.broadcast %115 : vector<16x1xf32> to vector<16x32xf32>
    %117 = arith.mulf %107, %116 : vector<16x32xf32>
    %118 = vector.broadcast %13 : vector<1x32xf32> to vector<16x32xf32>
    %119 = arith.mulf %117, %118 : vector<16x32xf32>
    %120 = vector.broadcast %14 : vector<1x32xf32> to vector<16x32xf32>
    %121 = arith.addf %119, %120 : vector<16x32xf32>
    %cst_34 = arith.constant dense<0.000000e+00> : vector<16x64xf32>
    %122 = tpu.matmul %121, %6, %cst_34 {dimension_numbers = #tpu.dot_dimension_numbers<[1], [0], [0], [1], [0, 0, 1, 1], [], []>} : vector<16x32xf32>, vector<32x64xf32>, vector<16x64xf32> -> vector<16x64xf32>
    %123 = vector.broadcast %11 : vector<1x64xf32> to vector<16x64xf32>
    %124 = arith.addf %122, %123 : vector<16x64xf32>
    %cst_35 = arith.constant 0.000000e+00 : f32
    %125 = vector.broadcast %cst_35 : f32 to vector<16x64xf32>
    %126 = arith.maximumf %124, %125 : vector<16x64xf32>
    %cst_36 = arith.constant dense<0.000000e+00> : vector<16x32xf32>
    %127 = tpu.matmul %126, %7, %cst_36 {dimension_numbers = #tpu.dot_dimension_numbers<[1], [1], [0], [0], [0, 0, 1, 0], [], []>} : vector<16x64xf32>, vector<32x64xf32>, vector<16x32xf32> -> vector<16x32xf32>
    %128 = vector.broadcast %12 : vector<1x32xf32> to vector<16x32xf32>
    %129 = arith.addf %127, %128 : vector<16x32xf32>
    %130 = arith.addf %121, %129 : vector<16x32xf32>
    %cst_37 = arith.constant dense<0.000000e+00> : vector<16xf32>
    %131 = vector.multi_reduction <add>, %130, %cst_37 [1] : vector<16x32xf32> to vector<16xf32>
    %132 = vector.shape_cast %131 : vector<16xf32> to vector<16x1xf32>
    %cst_38 = arith.constant 3.200000e+01 : f32
    %133 = vector.broadcast %cst_38 : f32 to vector<16x1xf32>
    %134 = arith.divf %132, %133 : vector<16x1xf32>
    %135 = vector.broadcast %134 : vector<16x1xf32> to vector<16x32xf32>
    %136 = arith.subf %130, %135 : vector<16x32xf32>
    %137 = arith.mulf %136, %136 : vector<16x32xf32>
    %cst_39 = arith.constant dense<0.000000e+00> : vector<16xf32>
    %138 = vector.multi_reduction <add>, %137, %cst_39 [1] : vector<16x32xf32> to vector<16xf32>
    %139 = vector.shape_cast %138 : vector<16xf32> to vector<16x1xf32>
    %cst_40 = arith.constant 3.200000e+01 : f32
    %140 = vector.broadcast %cst_40 : f32 to vector<16x1xf32>
    %141 = arith.divf %139, %140 : vector<16x1xf32>
    %cst_41 = arith.constant 9.99999974E-6 : f32
    %142 = vector.broadcast %cst_41 : f32 to vector<16x1xf32>
    %143 = arith.addf %141, %142 : vector<16x1xf32>
    %144 = math.rsqrt %143 : vector<16x1xf32>
    %145 = vector.broadcast %144 : vector<16x1xf32> to vector<16x32xf32>
    %146 = arith.mulf %136, %145 : vector<16x32xf32>
    %147 = vector.broadcast %15 : vector<1x32xf32> to vector<16x32xf32>
    %148 = arith.mulf %146, %147 : vector<16x32xf32>
    %149 = vector.broadcast %16 : vector<1x32xf32> to vector<16x32xf32>
    %150 = arith.addf %148, %149 : vector<16x32xf32>
    %c0_42 = arith.constant 0 : index
    %c0_43 = arith.constant 0 : index
    %151 = vector.load %arg4[%c0_42, %c0_43] : memref<16x32xf32, #tpu.memory_space<vmem>>, vector<16x32xf32>
    tpu.vector_store %arg4[%c0_42, %c0_43], %150 {strides = array<i32>} : memref<16x32xf32, #tpu.memory_space<vmem>>, vector<16x32xf32>,
    return
  }
  func.func @transform_0(%arg0: i32) -> (i32, i32) {
    %c0_i32 = arith.constant 0 : i32
    %c0_i32_0 = arith.constant 0 : i32
    %c0_i32_1 = arith.constant 0 : i32
    return %c0_i32, %c0_i32_0 : i32, i32
  }
  func.func @transform_1(%arg0: i32) -> (i32, i32) {
    %c0_i32 = arith.constant 0 : i32
    %c0_i32_0 = arith.constant 0 : i32
    %c0_i32_1 = arith.constant 0 : i32
    return %c0_i32, %c0_i32_0 : i32, i32
  }
  func.func @transform_2(%arg0: i32) -> (i32, i32) {
    %c0_i32 = arith.constant 0 : i32
    %c0_i32_0 = arith.constant 0 : i32
    %c0_i32_1 = arith.constant 0 : i32
    return %c0_i32, %c0_i32_0 : i32, i32
  }
  func.func @transform_3(%arg0: i32) -> (i32, i32) {
    %c0_i32 = arith.constant 0 : i32
    %c0_i32_0 = arith.constant 0 : i32
    %c0_i32_1 = arith.constant 0 : i32
    return %c0_i32, %c0_i32_0 : i32, i32
  }
}

</mosaic_0001>

<bundles_post_ra>
// kernel: tpu_custom_call.1
= control target key start
LH: loop header
LB: loop body
LE: loop exit
PB: predicated region body
PF: predicated region fallthrough
CT: control target
= control target key end

     0   :  { %8 = vsyncpa [#allocation3], 0  ;;  %s1461_s0 = inlined_call_operand.hbm [shape: f32[16,32], index: 0, kind: input, shape index: {}]   ;;  %s1462_s1 = inlined_call_operand.hbm [shape: f32[16,16], index: 1, kind: input, shape index: {}]   ;;  %s1463_s2 = inlined_call_operand.hbm [shape: f32[40,256], index: 2, kind: input, shape index: {}]   ;;  %s1464_s3 = inlined_call_operand.hbm [shape: f32[16,32], index: 3, kind: output, shape index: {}]  }
   0x1   :  { %9 = vsyncpa [#allocation6], 0 }
   0x2   :  { %10 = vsyncpa [#allocation4], 0  ;;  %s28_s14 = sshll.u32 %s1462_s1, 4  ;;  %s1197_s15 = smov [#allocation5]   ;;  %s29_s14 = int_to_ptr.hbm [resolvable:$true] %s28_s14 }
   0x3   :  { %s30_s16 = sshll.u32 %s1197_s15, 4  ;;  %s15_s19 = sshll.u32 %s1461_s0, 4  ;;  %s31_s16 = int_to_ptr.vmem [resolvable:$true] %s30_s16  ;;  %s16_s19 = int_to_ptr.hbm [resolvable:$true] %s15_s19 }
   0x4   :  { %s1198_s20 = smov 128   ;;  %s1199_s21 = smov 8  }
   0x5   :  { %36 = dma.hbm_to_vmem [thread:$0]  %s29_s14, 256, %s31_s16, [#allocation6], %s1198_s20, %s1198_s20, %s1199_s21  }
   0x6   :  { %s1200_s22 = smov [#allocation2]   ;;  %s41_s1 = sshll.u32 %s1463_s2, 4  ;;  %s42_s1 = int_to_ptr.hbm [resolvable:$true] %s41_s1 }
   0x7   :  { %s17_s23 = sshll.u32 %s1200_s22, 4  ;;  %s1201_s0 = smov [#allocation7]   ;;  %s18_s23 = int_to_ptr.vmem [resolvable:$true] %s17_s23 }
   0x8   :  { %23 = dma.hbm_to_vmem [thread:$0]  %s16_s19, 256, %s18_s23, [#allocation3], %s1198_s20, %s1198_s20, %s1199_s21  }
   0x9   :  { %s43_s26 = sshll.u32 %s1201_s0, 4  ;;  %s1202_s27 = smov 256   ;;  %s44_s26 = int_to_ptr.vmem [resolvable:$true] %s43_s26 }
   0xa   :  { %s1203_s28 = smov 16  }
   0xb   :  { %49 = dma.hbm_to_vmem [thread:$0]  %s42_s1, 1280, %s44_s26, [#allocation6], %s1202_s27, %s1202_s27, %s1203_s28  }
   0xc   :  { %1191 = dma.done.wait [#allocation3], 256  }
   0xd   :  { %1192 = vsyncadd [#allocation3], 4294967040 }
   0xe   :  { %1193 = dma.done.wait [#allocation6], 1536  }
   0xf   :  { %1194 = vsyncadd [#allocation6], 4294965760  ;;  %v1253_v0 = vld [vmem:[#allocation7 + $0x30] sm:$0xff]  ;;  %v1255_v1 = vld [vmem:[#allocation7 + $0x20] sm:$0xff]  ;;  %vm76_vm0 = vcmask 261120   ;;  %s1204_s2 = smov 96  }
  0x10   :  { %1007 = vmatpush.msra.mxu3 %v1253_v0  ;;  %95 = vmatpush.msra.mxu0 %v1253_v0  ;;  %v1259_v2 = vld [vmem:[#allocation7 + $0x10] sm:$0xff]  ;;  %v66_v3 = vld [vmem:[#allocation7] sm:$0xff]  ;;  %v1264_v4 = vld [vmem:[#allocation2 + $0x8] sm:$0xff]  ;;  %s1205_s29 = smov 64   ;;  %s1206_s30 = smov 120   ;;  %vm112_vm1 = vcmask 64512  }
  0x11   :  { %v1267_v5 = vld [vmem:[#allocation2] sm:$0xff]  ;;  %s1207_s4 = smov 32   ;;  %s1208_s5 = smov 80   ;;  %v1303_v21 = vld [vmem:[#allocation5] sm:$0xff]  ;;  %vm148_vm2 = vcmask 130048   ;;  %v1307_v26 = vld [vmem:[#allocation5 + $0x8] sm:$0xff] }
  0x12   :  { %1008 = vmatpush.msra.mxu3 %v1255_v1  ;;  %96 = vmatpush.msra.mxu0 %v1255_v1  ;;  %v1273_v6 = vld [vmem:[#allocation7 + $0x40] sm:$0xff]  ;;  %s1209_s6 = smov 104   ;;  %s1210_s7 = smov 88  }
  0x13   :  { %v75_v7 = vperm.slane %v1273_v6, 0  ;;  %s1211_s8 = smov 72   ;;  %s1212_s9 = smov 112  }
  0x14   :  { %1009 = vmatpush.msra.mxu3 %v1259_v2  ;;  %97 = vmatpush.msra.mxu0 %v1259_v2  ;;  %s1213_s10 = smov 56   ;;  %s1214_s11 = smov 48  }
  0x15   :  { %s1215_s12 = smov 40   ;;  %s1217_s13 = smov [#allocation8]  }
  0x16   :  { %1010 = vmatpush.msra.mxu3 %v66_v3  ;;  %98 = vmatpush.msra.mxu0 %v66_v3  ;;  %s949_s14 = sshll.u32 %s1217_s13, 4  ;;  %s951_s17 = sshll.u32 %s1464_s3, 4  ;;  %s950_s14 = int_to_ptr.vmem [resolvable:$true] %s949_s14  ;;  %s952_s17 = int_to_ptr.hbm [resolvable:$true] %s951_s17 }
  0x17   :  { %966 = vmatmul.msk.f32.vlgmr.msra.gmra.mxu3 %vm76_vm0, %v1264_v4  ;;  %965 = vmatmul.msk.f32.vlgmr.msra.gmra.mxu0 %vm76_vm0, %v1267_v5 }
  0x94   :  { %v100_v10 = vpop.f32.mrf.mxu0 }
  0x95   :  { %v1279_v11 = vadd.f32 %v100_v10, %v75_v7 }
  0x9a   :  { %v103_v8 = vpop.f32.mrf.mxu3 }
  0x9b   :  { %v1276_v9 = vadd.f32 %v103_v8, %v75_v7 }
  0x9d   :  { %110 = vrot.lane.b32.xlu0 %v1276_v9, %s1204_s2  ;;  %v1284_v12 = vpack.i.bf16 %v1279_v11, %v1276_v9 }
  0xa5   :  { %108 = vrot.lane.b32.xlu0 %v1279_v11, %s1204_s2 }
  0xad   :  { %1033 = vrot.lane.b32.xlu0 %v1284_v12, %s1205_s29 }
  0xb5   :  { %232 = vrot.lane.b32.xlu0 %v1279_v11, %s1206_s30 }
  0xbd   :  { %392 = vrot.lane.b32.xlu0 %v66_v3, %s1207_s4 }
  0xc5   :  { %234 = vrot.lane.b32.xlu0 %v1276_v9, %s1206_s30 }
  0xcd   :  { %428 = vrot.lane.b32.xlu0 %v1279_v11, %s1208_s5 }
  0xd5   :  { %585 = vrot.lane.b32.xlu0 %v1279_v11, %s1209_s6 }
 0x10f   :  { %v111_v13 = vpop.permute.xlu0 %110 }
 0x110   :  { %967 = vmatpush.xpose.msk.msra.mxu1 %vm112_vm1, %v111_v13 }
 0x117   :  { %v109_v14 = vpop.permute.xlu0 %108 }
 0x118   :  { %968 = vmatpush.xpose.msk.msra.mxu1 %vm112_vm1, %v109_v14 }
 0x11b   :  { %969 = vmatmul.msk.f32.vlgmr.msra.gmra.mxu1 %vm112_vm1, %v1279_v11 }
 0x11f   :  { %v1034_v15 = vpop.permute.xlu0 %1033 }
 0x120   :  { %v1035_v16 = vunpack.i.l.bf16 %v1034_v15  ;;  %v1036_v17 = vunpack.i.h.bf16 %v1034_v15 }
 0x122   :  { %223 = vmatpush.msra.mxu2 %v1035_v16 }
 0x123   :  { %970 = vmatmul.msk.f32.gmra.mxu1 %vm112_vm1, %v1276_v9 }
 0x124   :  { %224 = vmatpush.msra.mxu2 %v1036_v17 }
 0x127   :  { %v1301_v18 = vpop.permute.xlu0 %232 }
 0x12f   :  { %v393_v19 = vpop.permute.xlu0 %392 }
 0x130   :  { %416 = vmatpush.msrb.mxu1 %v393_v19 }
 0x137   :  { %v235_v57 = vpop.permute.xlu0 %234 }
 0x198   :  { %v138_v20 = vpop.f32.mrf.mxu1 }
 0x199   :  { %v144_v22 = vmul.f32 0.35355338, %v138_v20 }
 0x19b   :  { %v146_v23 = vadd.f32 %v144_v22, %v1303_v21 }
 0x19d   :  { %v149_v24 = vsel %vm148_vm2, %v146_v23, -inf }
 0x19e   :  { %150 = vmax.xlane.f32.xlu1 %v149_v24 }
 0x1a0   :  { %v141_v25 = vpop.f32.mrf.mxu1 }
 0x1a1   :  { %v145_v27 = vmul.f32 0.35355338, %v141_v25 }
 0x1a3   :  { %v147_v28 = vadd.f32 %v145_v27, %v1307_v26 }
 0x1a5   :  { %v152_v29 = vsel %vm148_vm2, %v147_v28, -inf }
 0x1a6   :  { %153 = vmax.xlane.f32.xlu1 %v152_v29 }
 0x1bf   :  { %238 = vrot.lane.b32.xlu1 %v1276_v9, %s1210_s7 }
 0x1c7   :  { %591 = vrot.lane.b32.xlu1 %v1276_v9, %s1211_s8 }
 0x1cf   :  { %424 = vrot.lane.b32.xlu1 %v1279_v11, %s1212_s9 }
 0x1d7   :  { %587 = vrot.lane.b32.xlu1 %v1276_v9, %s1209_s6 }
 0x211   :  { %v151_v30 = vpop.xlane.xlu1 %150 }
 0x212   :  { %v155_v31 = vsub.f32 %v146_v23, %v151_v30 }
 0x214   :  { %v157_v32 = vmul.f32 1.442695, %v155_v31 }
 0x216   :  { %1052 = vpow2.f32 %v157_v32 }
 0x219   :  { %v154_v33 = vpop.xlane.xlu1 %153 }
 0x21a   :  { %v156_v34 = vsub.f32 %v147_v28, %v154_v33 }
 0x21c   :  { %v1053_v35 = vpop.eup %1052  ;;  %v159_v36 = vmul.f32 1.442695, %v156_v34 }
 0x21d   :  { %v161_v37 = vsel %vm148_vm2, %v1053_v35, 0.0 }
 0x21e   :  { %1054 = vpow2.f32 %v159_v36  ;;  %162 = vadd.xlane.f32.xlu2 %v161_v37 }
 0x224   :  { %v1055_v38 = vpop.eup %1054 }
 0x225   :  { %v164_v39 = vsel %vm148_vm2, %v1055_v38, 0.0 }
 0x226   :  { %165 = vadd.xlane.f32.xlu2 %v164_v39 }
 0x231   :  { %v239_v40 = vpop.permute.xlu1 %238 }
 0x232   :  { %973 = vmatpush.xpose.msk.msrb.mxu3 %vm112_vm1, %v239_v40 }
 0x239   :  { %v592_v41 = vpop.permute.xlu1 %591 }
 0x23a   :  { %991 = vmatpush.xpose.msk.msra.mxu1 %vm112_vm1, %v592_v41 }
 0x23e   :  { %236 = vrot.lane.b32.xlu2 %v1279_v11, %s1210_s7 }
 0x241   :  { %v425_v14 = vpop.permute.xlu1 %424 }
 0x246   :  { %430 = vrot.lane.b32.xlu2 %v1276_v9, %s1208_s5 }
 0x249   :  { %v588_v33 = vpop.permute.xlu1 %587 }
 0x24e   :  { %589 = vrot.lane.b32.xlu2 %v1279_v11, %s1211_s8  ;;  %v429_v11 = vpop.permute.xlu0 %428 }
 0x256   :  { %426 = vrot.lane.b32.xlu2 %v1276_v9, %s1212_s9  ;;  %v586_v28 = vpop.permute.xlu0 %585 }
 0x291   :  { %v163_v42 = vpop.xlane.xlu2 %162 }
 0x292   :  { %1056 = vrcp.f32 %v163_v42  ;;  %v178_v47 = vand.u32 2147483648, %v163_v42  ;;  %v176_v49 = vand.u32 2147483647, %v163_v42  ;;  %vm172_vm4 = vweird.f32 %v163_v42 }
 0x294   :  { %v179_v52 = vor.u32 1.1754944e-38, %v178_v47  ;;  %vm177_vm6 = vcmp.eq.f32.partialorder %v176_v49, 8.507059e+37 }
 0x298   :  { %v1057_v43 = vpop.eup %1056 }
 0x299   :  { %v168_v44 = vmul.f32 %v1057_v43, %v163_v42  ;;  %v166_v45 = vpop.xlane.xlu2 %165  ;;  %vm173_vm3 = vweird.f32 %v1057_v43 }
 0x29a   :  { %1058 = vrcp.f32 %v166_v45  ;;  %vm174_vm5 = vmor %vm172_vm4, %vm173_vm3  ;;  %v193_v60 = vand.u32 2147483648, %v166_v45  ;;  %v191_v62 = vand.u32 2147483647, %v166_v45  ;;  %vm187_vm8 = vweird.f32 %v166_v45 }
 0x29b   :  { %v169_v46 = vsub.f32 1.0, %v168_v44 }
 0x29c   :  { %v194_v3 = vor.u32 1.1754944e-38, %v193_v60  ;;  %vm192_vm10 = vcmp.eq.f32.partialorder %v191_v62, 8.507059e+37 }
 0x29d   :  { %v170_v48 = vmul.f32 %v1057_v43, %v169_v46 }
 0x29f   :  { %v171_v50 = vadd.f32 %v1057_v43, %v170_v48 }
 0x2a0   :  { %v1059_v51 = vpop.eup %1058 }
 0x2a1   :  { %v183_v53 = vmul.f32 %v1059_v51, %v166_v45  ;;  %v237_v54 = vpop.permute.xlu2 %236  ;;  %v175_v55 = vsel %vm174_vm5, %v1057_v43, %v171_v50  ;;  %vm188_vm7 = vweird.f32 %v1059_v51 }
 0x2a2   :  { %974 = vmatpush.xpose.msk.msrb.mxu3 %vm112_vm1, %v237_v54  ;;  %v180_v56 = vsel %vm177_vm6, %v179_v52, %v175_v55  ;;  %vm189_vm9 = vmor %vm187_vm8, %vm188_vm7 }
 0x2a3   :  { %v184_v58 = vsub.f32 1.0, %v183_v53  ;;  %v181_v59 = vmul.f32 %v1053_v35, %v180_v56 }
 0x2a5   :  { %v185_v61 = vmul.f32 %v1059_v51, %v184_v58  ;;  %971 = vmatmul.msk.f32.vlgmr.msra.gmra.mxu2 %vm148_vm2, %v181_v59  ;;  %975 = vmatmul.msk.f32.vlgmr.msrb.gmra.mxu3 %vm112_vm1, %v1301_v18 }
 0x2a7   :  { %v186_v63 = vadd.f32 %v1059_v51, %v185_v61 }
 0x2a9   :  { %v431_v7 = vpop.permute.xlu2 %430  ;;  %v190_v8 = vsel %vm189_vm9, %v1059_v51, %v186_v63 }
 0x2aa   :  { %983 = vmatpush.xpose.msk.msra.mxu3 %vm112_vm1, %v431_v7  ;;  %v195_v9 = vsel %vm192_vm10, %v194_v3, %v190_v8 }
 0x2ab   :  { %v196_v10 = vmul.f32 %v1055_v38, %v195_v9 }
 0x2ad   :  { %972 = vmatmul.msk.f32.gmra.mxu2 %vm148_vm2, %v196_v10  ;;  %976 = vmatmul.msk.f32.gmra.mxu3 %vm112_vm1, %v235_v57 }
 0x2ae   :  { %984 = vmatpush.xpose.msk.msra.mxu3 %vm112_vm1, %v429_v11 }
 0x2b1   :  { %v590_v13 = vpop.permute.xlu2 %589 }
 0x2b2   :  { %992 = vmatpush.xpose.msk.msra.mxu1 %vm112_vm1, %v590_v13 }
 0x2b5   :  { %985 = vmatmul.msk.f32.vlgmr.msra.gmra.mxu3 %vm112_vm1, %v425_v14 }
 0x2b9   :  { %v427_v15 = vpop.permute.xlu2 %426 }
 0x2bd   :  { %986 = vmatmul.msk.f32.gmra.mxu3 %vm112_vm1, %v427_v15 }
 0x328   :  { %v226_v16 = vpop.f32.mrf.mxu2  ;;  %v265_v17 = vpop.f32.mrf.mxu3 }
 0x329   :  { %v271_v18 = vmul.f32 0.35355338, %v265_v17  ;;  %981 = vmatmul.msk.f32.vlgmr.msrb.gmra.mxu1 %vm112_vm1, %v226_v16 }
 0x32b   :  { %v273_v19 = vadd.f32 %v271_v18, %v1303_v21 }
 0x32d   :  { %v275_v20 = vsel %vm148_vm2, %v273_v19, -inf }
 0x32e   :  { %276 = vmax.xlane.f32.xlu0 %v275_v20 }
 0x330   :  { %v229_v22 = vpop.f32.mrf.mxu2  ;;  %v268_v23 = vpop.f32.mrf.mxu3 }
 0x331   :  { %v272_v24 = vmul.f32 0.35355338, %v268_v23  ;;  %982 = vmatmul.msk.f32.gmra.mxu1 %vm112_vm1, %v229_v22 }
 0x333   :  { %v274_v25 = vadd.f32 %v272_v24, %v1307_v26 }
 0x335   :  { %v278_v27 = vsel %vm148_vm2, %v274_v25, -inf }
 0x336   :  { %279 = vmax.xlane.f32.xlu2 %v278_v27 }
 0x338   :  { %v457_v29 = vpop.f32.mrf.mxu3 }
 0x339   :  { %v463_v30 = vmul.f32 0.35355338, %v457_v29  ;;  %993 = vmatmul.msk.f32.vlgmr.msra.gmra.mxu1 %vm112_vm1, %v586_v28 }
 0x33b   :  { %v465_v31 = vadd.f32 %v463_v30, %v1303_v21 }
 0x33d   :  { %v467_v32 = vsel %vm148_vm2, %v465_v31, -inf }
 0x33e   :  { %468 = vmax.xlane.f32.xlu2 %v467_v32 }
 0x340   :  { %v460_v47 = vpop.f32.mrf.mxu3 }
 0x341   :  { %994 = vmatmul.msk.f32.gmra.mxu1 %vm112_vm1, %v588_v33  ;;  %v464_v50 = vmul.f32 0.35355338, %v460_v47 }
 0x343   :  { %v466_v57 = vadd.f32 %v464_v50, %v1307_v26 }
 0x3a1   :  { %v277_v34 = vpop.xlane.xlu0 %276 }
 0x3a2   :  { %v281_v35 = vsub.f32 %v273_v19, %v277_v34 }
 0x3a4   :  { %v283_v36 = vmul.f32 1.442695, %v281_v35 }
 0x3a6   :  { %1060 = vpow2.f32 %v283_v36  ;;  %v1346_v37 = vpop.f32.mrf.mxu1 }
 0x3a9   :  { %v280_v38 = vpop.xlane.xlu2 %279 }
 0x3aa   :  { %v282_v49 = vsub.f32 %v274_v25, %v280_v38 }
 0x3ac   :  { %v1348_v39 = vpop.eup %1060  ;;  %v285_v54 = vmul.f32 1.442695, %v282_v49 }
 0x3ad   :  { %v287_v40 = vsel %vm148_vm2, %v1348_v39, 0.0 }
 0x3ae   :  { %288 = vadd.xlane.f32.xlu2 %v287_v40  ;;  %v1352_v41 = vpop.f32.mrf.mxu1 }
 0x3b1   :  { %v469_v42 = vpop.xlane.xlu2 %468 }
 0x3b2   :  { %v473_v43 = vsub.f32 %v465_v31, %v469_v42 }
 0x3b4   :  { %v475_v44 = vmul.f32 1.442695, %v473_v43 }
 0x3b6   :  { %1062 = vpow2.f32 %v475_v44  ;;  %v618_v45 = vpop.f32.mrf.mxu1 }
 0x3b7   :  { %v624_v46 = vmul.f32 0.35355338, %v618_v45  ;;  %1064 = vpow2.f32 %v285_v54 }
 0x3b9   :  { %v626_v48 = vadd.f32 %v624_v46, %v1303_v21  ;;  %v470_v21 = vsel %vm148_vm2, %v466_v57, -inf }
 0x3bb   :  { %v628_v51 = vsel %vm148_vm2, %v626_v48, -inf }
 0x3bc   :  { %v1356_v52 = vpop.eup %1062  ;;  %629 = vmax.xlane.f32.xlu1 %v628_v51 }
 0x3bd   :  { %v479_v53 = vsel %vm148_vm2, %v1356_v52, 0.0  ;;  %v1364_v60 = vpop.eup %1064 }
 0x3be   :  { %480 = vadd.xlane.f32.xlu2 %v479_v53  ;;  %v621_v55 = vpop.f32.mrf.mxu1  ;;  %v290_v61 = vsel %vm148_vm2, %v1364_v60, 0.0 }
 0x3bf   :  { %v625_v56 = vmul.f32 0.35355338, %v621_v55 }
 0x3c1   :  { %v627_v58 = vadd.f32 %v625_v56, %v1307_v26 }
 0x3c3   :  { %v631_v59 = vsel %vm148_vm2, %v627_v58, -inf }
 0x3c4   :  { %471 = vmax.xlane.f32.xlu1 %v470_v21  ;;  %632 = vmax.xlane.f32.xlu0 %v631_v59 }
 0x3cc   :  { %291 = vadd.xlane.f32.xlu0 %v290_v61 }
 0x3e0   :  { %1038 = vrot.lane.b32.xlu0 %v1284_v12, %s1213_s10 }
 0x3e8   :  { %359 = vrot.lane.b32.xlu0 %v1259_v2, %s1207_s4 }
 0x3f0   :  { %712 = vrot.lane.b32.xlu0 %v1253_v0, %s1207_s4 }
 0x421   :  { %v289_v3 = vpop.xlane.xlu2 %288 }
 0x422   :  { %v304_v29 = vand.u32 2147483648, %v289_v3  ;;  %vm298_vm12 = vweird.f32 %v289_v3  ;;  %v302_v30 = vand.u32 2147483647, %v289_v3 }
 0x424   :  { %v305_v33 = vor.u32 1.1754944e-38, %v304_v29  ;;  %vm303_vm14 = vcmp.eq.f32.partialorder %v302_v30, 8.507059e+37 }
 0x42f   :  { %v630_v26 = vpop.xlane.xlu1 %629 }
 0x430   :  { %v634_v62 = vsub.f32 %v626_v48, %v630_v26 }
 0x432   :  { %v636_v63 = vmul.f32 1.442695, %v634_v62 }
 0x434   :  { %1066 = vpow2.f32 %v636_v63 }
 0x435   :  { %1068 = vrcp.f32 %v289_v3 }
 0x437   :  { %v472_v7 = vpop.xlane.xlu1 %471  ;;  %v633_v8 = vpop.xlane.xlu0 %632 }
 0x438   :  { %v474_v9 = vsub.f32 %v466_v57, %v472_v7  ;;  %v635_v10 = vsub.f32 %v627_v58, %v633_v8 }
 0x43a   :  { %v1373_v11 = vpop.eup %1066  ;;  %v477_v13 = vmul.f32 1.442695, %v474_v9  ;;  %v638_v14 = vmul.f32 1.442695, %v635_v10 }
 0x43b   :  { %v640_v2 = vsel %vm148_vm2, %v1373_v11, 0.0  ;;  %v1069_v0 = vpop.eup %1068 }
 0x43c   :  { %1070 = vpow2.f32 %v477_v13  ;;  %641 = vadd.xlane.f32.xlu1 %v640_v2  ;;  %v294_v16 = vmul.f32 %v1069_v0, %v289_v3  ;;  %vm299_vm11 = vweird.f32 %v1069_v0 }
 0x43d   :  { %1072 = vpow2.f32 %v638_v14  ;;  %vm300_vm13 = vmor %vm298_vm12, %vm299_vm11 }
 0x43e   :  { %v295_v20 = vsub.f32 1.0, %v294_v16 }
 0x43f   :  { %v292_v15 = vpop.xlane.xlu0 %291 }
 0x440   :  { %1074 = vrcp.f32 %v292_v15  ;;  %v296_v24 = vmul.f32 %v1069_v0, %v295_v20  ;;  %v319_v40 = vand.u32 2147483648, %v292_v15  ;;  %vm313_vm3 = vweird.f32 %v292_v15 }
 0x441   :  { %v317_v44 = vand.u32 2147483647, %v292_v15 }
 0x442   :  { %v1377_v17 = vpop.eup %1070  ;;  %v297_v27 = vadd.f32 %v1069_v0, %v296_v24  ;;  %v320_v46 = vor.u32 1.1754944e-38, %v319_v40 }
 0x443   :  { %v1379_v18 = vpop.eup %1072  ;;  %v482_v19 = vsel %vm148_vm2, %v1377_v17, 0.0  ;;  %vm318_vm5 = vcmp.eq.f32.partialorder %v317_v44, 8.507059e+37 }
 0x444   :  { %483 = vadd.xlane.f32.xlu2 %v482_v19  ;;  %v643_v22 = vsel %vm148_vm2, %v1379_v18, 0.0  ;;  %v301_v32 = vsel %vm300_vm13, %v1069_v0, %v297_v27 }
 0x445   :  { %644 = vadd.xlane.f32.xlu1 %v643_v22  ;;  %v306_v36 = vsel %vm303_vm14, %v305_v33, %v301_v32 }
 0x446   :  { %v1075_v23 = vpop.eup %1074  ;;  %v307_v43 = vmul.f32 %v1348_v39, %v306_v36  ;;  %v481_v39 = vpop.xlane.xlu2 %480 }
 0x447   :  { %v309_v25 = vmul.f32 %v1075_v23, %v292_v15  ;;  %vm314_vm15 = vweird.f32 %v1075_v23  ;;  %1076 = vrcp.f32 %v481_v39  ;;  %v496_v57 = vand.u32 2147483648, %v481_v39 }
 0x448   :  { %vm315_vm4 = vmor %vm313_vm3, %vm314_vm15  ;;  %vm490_vm7 = vweird.f32 %v481_v39 }
 0x449   :  { %v310_v28 = vsub.f32 1.0, %v309_v25  ;;  %v497_v61 = vor.u32 1.1754944e-38, %v496_v57  ;;  %v746_v57 = vperm.slane %v1273_v6, 1 }
 0x44b   :  { %v311_v31 = vmul.f32 %v1075_v23, %v310_v28 }
 0x44d   :  { %v312_v38 = vadd.f32 %v1075_v23, %v311_v31  ;;  %v1077_v49 = vpop.eup %1076 }
 0x44e   :  { %v486_v50 = vmul.f32 %v1077_v49, %v481_v39  ;;  %vm491_vm6 = vweird.f32 %v1077_v49 }
 0x44f   :  { %v316_v45 = vsel %vm315_vm4, %v1075_v23, %v312_v38  ;;  %vm492_vm8 = vmor %vm490_vm7, %vm491_vm6 }
 0x450   :  { %v321_v47 = vsel %vm318_vm5, %v320_v46, %v316_v45  ;;  %v487_v53 = vsub.f32 1.0, %v486_v50 }
 0x451   :  { %v322_v48 = vmul.f32 %v1364_v60, %v321_v47 }
 0x452   :  { %v1039_v34 = vpop.permute.xlu0 %1038  ;;  %v488_v54 = vmul.f32 %v1077_v49, %v487_v53 }
 0x453   :  { %v1040_v35 = vunpack.i.l.bf16 %v1039_v34  ;;  %v1041_v42 = vunpack.i.h.bf16 %v1039_v34 }
 0x455   :  { %349 = vmatpush.msrb.mxu2 %v1040_v35 }
 0x457   :  { %350 = vmatpush.msrb.mxu2 %v1041_v42 }
 0x458   :  { %977 = vmatmul.msk.f32.vlgmr.msrb.gmra.mxu2 %vm148_vm2, %v307_v43 }
 0x45a   :  { %v360_v55 = vpop.permute.xlu0 %359 }
 0x45b   :  { %383 = vmatpush.msrb.mxu0 %v360_v55 }
 0x45c   :  { %1048 = vrot.lane.b32.xlu2 %v1284_v12, %s1214_s11 }
 0x45e   :  { %1043 = vrot.lane.b32.xlu1 %v1284_v12, %s1215_s12  ;;  %v489_v12 = vadd.f32 %v1077_v49, %v488_v54 }
 0x460   :  { %978 = vmatmul.msk.f32.gmra.mxu2 %vm148_vm2, %v322_v48  ;;  %v493_v59 = vsel %vm492_vm8, %v1077_v49, %v489_v12 }
 0x466   :  { %551 = vrot.lane.b32.xlu1 %v1255_v1, %s1207_s4  ;;  %v494_v1 = vand.u32 2147483647, %v481_v39  ;;  %v713_v39 = vpop.permute.xlu0 %712 }
 0x468   :  { %vm495_vm9 = vcmp.eq.f32.partialorder %v494_v1, 8.507059e+37 }
 0x469   :  { %v498_v3 = vsel %vm495_vm9, %v497_v61, %v493_v59 }
 0x46a   :  { %v499_v0 = vmul.f32 %v1356_v52, %v498_v3 }
 0x4af   :  { %v642_v51 = vpop.xlane.xlu1 %641 }
 0x4b0   :  { %1078 = vrcp.f32 %v642_v51  ;;  %v657_v28 = vand.u32 2147483648, %v642_v51  ;;  %vm651_vm15 = vweird.f32 %v642_v51  ;;  %v655_v29 = vand.u32 2147483647, %v642_v51 }
 0x4b2   :  { %v658_v32 = vor.u32 1.1754944e-38, %v657_v28  ;;  %vm656_vm4 = vcmp.eq.f32.partialorder %v655_v29, 8.507059e+37  ;;  %v71_v28 = vld [vmem:[#allocation7 + $0x28] sm:$0xff] }
 0x4b3   :  { %v67_v29 = vld [vmem:[#allocation7 + $0x8] sm:$0xff] }
 0x4b6   :  { %v1079_v21 = vpop.eup %1078 }
 0x4b7   :  { %v484_v56 = vpop.xlane.xlu2 %483  ;;  %v647_v26 = vmul.f32 %v1079_v21, %v642_v51  ;;  %vm652_vm14 = vweird.f32 %v1079_v21 }
 0x4b8   :  { %1080 = vrcp.f32 %v484_v56  ;;  %v1393_v58 = vpop.xlane.xlu1 %644  ;;  %v511_v10 = vand.u32 2147483648, %v484_v56  ;;  %v509_v15 = vand.u32 2147483647, %v484_v56  ;;  %vm505_vm11 = vweird.f32 %v484_v56  ;;  %vm653_vm3 = vmor %vm651_vm15, %vm652_vm14 }
 0x4b9   :  { %1082 = vrcp.f32 %v1393_v58  ;;  %v648_v9 = vsub.f32 1.0, %v647_v26  ;;  %v672_v38 = vand.u32 2147483648, %v1393_v58  ;;  %vm666_vm6 = vweird.f32 %v1393_v58 }
 0x4ba   :  { %v512_v20 = vor.u32 1.1754944e-38, %v511_v10  ;;  %vm510_vm13 = vcmp.eq.f32.partialorder %v509_v15, 8.507059e+37  ;;  %v670_v42 = vand.u32 2147483647, %v1393_v58  ;;  %vm853_vm14 = vcmask 523264  }
 0x4bb   :  { %v649_v19 = vmul.f32 %v1079_v21, %v648_v9  ;;  %v673_v44 = vor.u32 1.1754944e-38, %v672_v38  ;;  %v1216_v9 = vmov 32.0  }
 0x4bc   :  { %vm671_vm8 = vcmp.eq.f32.partialorder %v670_v42, 8.507059e+37  ;;  %1084 = vrcp.f32 %v1216_v9 }
 0x4bd   :  { %v650_v25 = vadd.f32 %v1079_v21, %v649_v19 }
 0x4be   :  { %v1081_v60 = vpop.eup %1080 }
 0x4bf   :  { %v501_v62 = vmul.f32 %v1081_v60, %v484_v56  ;;  %v1049_v63 = vpop.permute.xlu2 %1048  ;;  %v1083_v14 = vpop.eup %1082  ;;  %vm506_vm10 = vweird.f32 %v1081_v60  ;;  %v654_v30 = vsel %vm653_vm3, %v1079_v21, %v650_v25 }
 0x4c0   :  { %v1050_v7 = vunpack.i.l.bf16 %v1049_v63  ;;  %v1051_v13 = vunpack.i.h.bf16 %v1049_v63  ;;  %v662_v22 = vmul.f32 %v1083_v14, %v1393_v58  ;;  %vm507_vm12 = vmor %vm505_vm11, %vm506_vm10  ;;  %v659_v34 = vsel %vm656_vm4, %v658_v32, %v654_v30 }
 0x4c1   :  { %v502_v8 = vsub.f32 1.0, %v501_v62  ;;  %vm667_vm5 = vweird.f32 %v1083_v14 }
 0x4c2   :  { %541 = vmatpush.msra.mxu2 %v1050_v7  ;;  %v663_v27 = vsub.f32 1.0, %v662_v22  ;;  %vm668_vm7 = vmor %vm666_vm6, %vm667_vm5  ;;  %v1085_v10 = vpop.eup %1084 }
 0x4c3   :  { %v503_v2 = vmul.f32 %v1081_v60, %v502_v8 }
 0x4c4   :  { %542 = vmatpush.msra.mxu2 %v1051_v13  ;;  %v664_v31 = vmul.f32 %v1083_v14, %v663_v27  ;;  %v758_v13 = vmul.f32 32.0, %v1085_v10  ;;  %v73_v27 = vld [vmem:[#allocation7 + $0x38] sm:$0xff] }
 0x4c5   :  { %987 = vmatmul.msk.f32.vlgmr.msra.gmra.mxu2 %vm148_vm2, %v499_v0  ;;  %v504_v16 = vadd.f32 %v1081_v60, %v503_v2 }
 0x4c6   :  { %v665_v36 = vadd.f32 %v1083_v14, %v664_v31  ;;  %736 = vmatpush.msrb.mxu2 %v713_v39  ;;  %v805_v39 = vperm.slane %v1273_v6, 5 }
 0x4c7   :  { %v508_v23 = vsel %vm507_vm12, %v1081_v60, %v504_v16 }
 0x4c8   :  { %v513_v24 = vsel %vm510_vm13, %v512_v20, %v508_v23  ;;  %v669_v43 = vsel %vm668_vm7, %v1083_v14, %v665_v36  ;;  %v759_v14 = vsub.f32 1.0, %v758_v13 }
 0x4c9   :  { %v514_v52 = vmul.f32 %v1377_v17, %v513_v24  ;;  %v660_v17 = vmul.f32 %v1373_v11, %v659_v34  ;;  %v674_v46 = vsel %vm671_vm8, %v673_v44, %v669_v43 }
 0x4ca   :  { %v675_v48 = vmul.f32 %v1379_v18, %v674_v46  ;;  %v802_v46 = vperm.slane %v1273_v6, 4 }
 0x4cd   :  { %988 = vmatmul.msk.f32.gmra.mxu2 %vm148_vm2, %v514_v52  ;;  %v69_v52 = vld [vmem:[#allocation7 + $0x18] sm:$0xff] }
 0x4d0   :  { %v1044_v33 = vpop.permute.xlu1 %1043 }
 0x4d1   :  { %v1045_v35 = vunpack.i.l.bf16 %v1044_v33  ;;  %v1046_v40 = vunpack.i.h.bf16 %v1044_v33 }
 0x4d3   :  { %702 = vmatpush.msrb.mxu3 %v1045_v35 }
 0x4d5   :  { %703 = vmatpush.msrb.mxu3 %v1046_v40 }
 0x4d6   :  { %995 = vmatmul.msk.f32.vlgmr.msrb.gmra.mxu3 %vm148_vm2, %v660_v17 }
 0x4d8   :  { %v552_v45 = vpop.permute.xlu1 %551 }
 0x4d9   :  { %575 = vmatpush.msra.mxu0 %v552_v45 }
 0x4db   :  { %v352_v47 = vpop.f32.mrf.mxu2 }
 0x4dc   :  { %979 = vmatmul.msk.f32.vlgmr.msrb.gmra.mxu0 %vm112_vm1, %v352_v47 }
 0x4dd   :  { %827 = vmatpush.msrb.mxu0 %v73_v27 }
 0x4de   :  { %996 = vmatmul.msk.f32.gmra.mxu3 %vm148_vm2, %v675_v48 }
 0x4df   :  { %828 = vmatpush.msrb.mxu0 %v71_v28 }
 0x4e1   :  { %829 = vmatpush.msrb.mxu0 %v69_v52 }
 0x4e3   :  { %v355_v11 = vpop.f32.mrf.mxu2  ;;  %830 = vmatpush.msrb.mxu0 %v67_v29 }
 0x4e4   :  { %980 = vmatmul.msk.f32.gmra.mxu0 %vm112_vm1, %v355_v11 }
 0x548   :  { %v544_v49 = vpop.f32.mrf.mxu2 }
 0x549   :  { %989 = vmatmul.msk.f32.vlgmr.msra.gmra.mxu0 %vm112_vm1, %v544_v49 }
 0x550   :  { %v547_v50 = vpop.f32.mrf.mxu2 }
 0x551   :  { %990 = vmatmul.msk.f32.gmra.mxu0 %vm112_vm1, %v547_v50 }
 0x559   :  { %v705_v51 = vpop.f32.mrf.mxu3  ;;  %v385_v18 = vpop.f32.mrf.mxu0 }
 0x55a   :  { %997 = vmatmul.msk.f32.vlgmr.msrb.gmra.mxu2 %vm112_vm1, %v705_v51  ;;  %v419_v56 = vadd.f32 %v1346_v37, %v385_v18 }
 0x561   :  { %v708_v53 = vpop.f32.mrf.mxu3  ;;  %v388_v54 = vpop.f32.mrf.mxu0 }
 0x562   :  { %998 = vmatmul.msk.f32.gmra.mxu2 %vm112_vm1, %v708_v53  ;;  %v422_v60 = vadd.f32 %v1352_v41, %v388_v54  ;;  %v760_v41 = vmul.f32 %v1085_v10, %v759_v14  ;;  %vm762_vm1 = vweird.f32 %v1085_v10 }
 0x564   :  { %v761_v2 = vadd.f32 %v1085_v10, %v760_v41 }
 0x5c6   :  { %v577_v55 = vpop.f32.mrf.mxu0 }
 0x5c7   :  { %v583_v12 = vadd.f32 %v577_v55, %v419_v56 }
 0x5ce   :  { %v580_v59 = vpop.f32.mrf.mxu0 }
 0x5cf   :  { %v584_v26 = vadd.f32 %v580_v59, %v422_v60  ;;  %v808_v59 = vperm.slane %v1273_v6, 2 }
 0x5dd   :  { %v738_v58 = vpop.f32.mrf.mxu2 }
 0x5de   :  { %v744_v21 = vadd.f32 %v738_v58, %v583_v12 }
 0x5e0   :  { %v747_v1 = vadd.f32 %v746_v57, %v744_v21 }
 0x5e2   :  { %v749_v61 = vadd.f32 %v747_v1, %v1267_v5  ;;  %v1421_v5 = vsel %vm762_vm1, %v1085_v10, %v761_v2 }
 0x5e4   :  { %v751_v62 = vsel %vm76_vm0, %v749_v61, 0.0 }
 0x5e5   :  { %v741_v63 = vpop.f32.mrf.mxu2  ;;  %752 = vadd.xlane.f32.xlu0 %v751_v62 }
 0x5e6   :  { %v745_v3 = vadd.f32 %v741_v63, %v584_v26 }
 0x5e8   :  { %v748_v7 = vadd.f32 %v746_v57, %v745_v3 }
 0x5ea   :  { %v750_v37 = vadd.f32 %v748_v7, %v1264_v4  ;;  %v840_v7 = vperm.slane %v1273_v6, 3 }
 0x5ec   :  { %v754_v8 = vsel %vm76_vm0, %v750_v37, 0.0 }
 0x5ed   :  { %755 = vadd.xlane.f32.xlu2 %v754_v8 }
 0x605   :  { %851 = vrot.lane.b32.xlu2 %v73_v27, %s1205_s29 }
 0x60d   :  { %845 = vrot.lane.b32.xlu2 %v67_v29, %s1205_s29 }
 0x658   :  { %v753_v0 = vpop.xlane.xlu0 %752 }
 0x659   :  { %v764_v15 = vmul.f32 %v1421_v5, %v753_v0 }
 0x65b   :  { %v766_v16 = vsub.f32 %v749_v61, %v764_v15 }
 0x65d   :  { %v768_v19 = vmul.f32 %v766_v16, %v766_v16 }
 0x65f   :  { %v770_v4 = vsel %vm76_vm0, %v768_v19, 0.0 }
 0x660   :  { %771 = vadd.xlane.f32.xlu1 %v770_v4  ;;  %v756_v20 = vpop.xlane.xlu2 %755 }
 0x661   :  { %v765_v22 = vmul.f32 %v1421_v5, %v756_v20 }
 0x663   :  { %v767_v23 = vsub.f32 %v750_v37, %v765_v22 }
 0x665   :  { %v769_v24 = vmul.f32 %v767_v23, %v767_v23 }
 0x667   :  { %v773_v25 = vsel %vm76_vm0, %v769_v24, 0.0 }
 0x668   :  { %774 = vadd.xlane.f32.xlu0 %v773_v25  ;;  %v852_v57 = vpop.permute.xlu2 %851 }
 0x669   :  { %1001 = vmatpush.xpose.msk.msrb.mxu1 %vm853_vm14, %v852_v57 }
 0x670   :  { %v846_v1 = vpop.permute.xlu2 %845 }
 0x679   :  { %849 = vrot.lane.b32.xlu1 %v71_v28, %s1205_s29 }
 0x67c   :  { %847 = vrot.lane.b32.xlu0 %v69_v52, %s1205_s29 }
 0x6d3   :  { %v772_v30 = vpop.xlane.xlu1 %771 }
 0x6d4   :  { %v776_v31 = vmul.f32 %v772_v30, %v1421_v5 }
 0x6d6   :  { %v778_v32 = vadd.f32 1e-05, %v776_v31 }
 0x6d8   :  { %1086 = vrsqrt.f32 %v778_v32  ;;  %vm786_vm9 = vweird.f32 %v778_v32 }
 0x6db   :  { %v775_v33 = vpop.xlane.xlu0 %774 }
 0x6dc   :  { %v777_v34 = vmul.f32 %v775_v33, %v1421_v5 }
 0x6de   :  { %v1087_v35 = vpop.eup %1086  ;;  %v779_v36 = vadd.f32 1e-05, %v777_v34 }
 0x6df   :  { %v781_v38 = vmul.f32 %v1087_v35, %v778_v32  ;;  %vm787_vm2 = vweird.f32 %v1087_v35 }
 0x6e0   :  { %1088 = vrsqrt.f32 %v779_v36  ;;  %vm788_vm10 = vmor %vm786_vm9, %vm787_vm2  ;;  %vm796_vm12 = vweird.f32 %v779_v36 }
 0x6e1   :  { %v782_v40 = vmul.f32 %v1087_v35, %v781_v38 }
 0x6e3   :  { %v783_v17 = vmul.f32 0.5, %v782_v40 }
 0x6e5   :  { %v784_v42 = vsub.f32 1.5, %v783_v17  ;;  %v1094_v17 = vld [vmem:[#allocation7 + $0x40] sm:$0xff] }
 0x6e6   :  { %v1089_v43 = vpop.eup %1088 }
 0x6e7   :  { %v785_v44 = vmul.f32 %v1087_v35, %v784_v42  ;;  %v791_v45 = vmul.f32 %v1089_v43, %v779_v36  ;;  %vm797_vm11 = vweird.f32 %v1089_v43  ;;  %v937_v42 = vperm.slane %v1094_v17, 6 }
 0x6e8   :  { %vm798_vm13 = vmor %vm796_vm12, %vm797_vm11 }
 0x6e9   :  { %v789_v47 = vsel %vm788_vm10, %v1087_v35, %v785_v44  ;;  %v792_v48 = vmul.f32 %v1089_v43, %v791_v45 }
 0x6ea   :  { %v800_v11 = vmul.f32 %v789_v47, %v766_v16 }
 0x6eb   :  { %v793_v49 = vmul.f32 0.5, %v792_v48  ;;  %v850_v58 = vpop.permute.xlu1 %849 }
 0x6ec   :  { %v803_v50 = vmul.f32 %v802_v46, %v800_v11  ;;  %1002 = vmatpush.xpose.msk.msrb.mxu1 %vm853_vm14, %v850_v58 }
 0x6ed   :  { %v794_v51 = vsub.f32 1.5, %v793_v49 }
 0x6ee   :  { %v806_v53 = vadd.f32 %v805_v39, %v803_v50  ;;  %v848_v21 = vpop.permute.xlu0 %847 }
 0x6ef   :  { %v795_v18 = vmul.f32 %v1089_v43, %v794_v51 }
 0x6f0   :  { %999 = vmatmul.msk.f32.vlgmr.msrb.gmra.mxu0 %vm76_vm0, %v806_v53  ;;  %1003 = vmatpush.xpose.msk.msrb.mxu1 %vm853_vm14, %v848_v21 }
 0x6f1   :  { %v799_v54 = vsel %vm798_vm13, %v1089_v43, %v795_v18 }
 0x6f2   :  { %v801_v55 = vmul.f32 %v799_v54, %v767_v23 }
 0x6f4   :  { %v804_v56 = vmul.f32 %v802_v46, %v801_v55  ;;  %1004 = vmatpush.xpose.msk.msrb.mxu1 %vm853_vm14, %v846_v1  ;;  %v940_v46 = vperm.slane %v1094_v17, 7 }
 0x6f6   :  { %v807_v12 = vadd.f32 %v805_v39, %v804_v56 }
 0x6f8   :  { %1000 = vmatmul.msk.f32.gmra.mxu0 %vm76_vm0, %v807_v12 }
 0x76d   :  { %v832_v60 = vpop.f32.mrf.mxu0 }
 0x76e   :  { %v833_v61 = vadd.f32 %v832_v60, %v808_v59 }
 0x770   :  { %v838_v26 = vmax.f32 %v833_v61, 0.0 }
 0x772   :  { %1005 = vmatmul.msk.f32.vlgmr.msrb.gmra.mxu1 %vm853_vm14, %v838_v26 }
 0x775   :  { %v835_v62 = vpop.f32.mrf.mxu0 }
 0x776   :  { %v836_v63 = vadd.f32 %v835_v62, %v808_v59 }
 0x778   :  { %v839_v3 = vmax.f32 %v836_v63, 0.0 }
 0x77a   :  { %1006 = vmatmul.msk.f32.gmra.mxu1 %vm853_vm14, %v839_v3 }
 0x7ef   :  { %v885_v37 = vpop.f32.mrf.mxu1 }
 0x7f0   :  { %v886_v8 = vadd.f32 %v885_v37, %v840_v7 }
 0x7f2   :  { %v891_v9 = vadd.f32 %v886_v8, %v806_v53 }
 0x7f4   :  { %v893_v10 = vsel %vm76_vm0, %v891_v9, 0.0 }
 0x7f5   :  { %894 = vadd.xlane.f32.xlu0 %v893_v10 }
 0x7f7   :  { %v888_v13 = vpop.f32.mrf.mxu1 }
 0x7f8   :  { %v889_v14 = vadd.f32 %v888_v13, %v840_v7 }
 0x7fa   :  { %v892_v41 = vadd.f32 %v889_v14, %v807_v12 }
 0x7fc   :  { %v896_v2 = vsel %vm76_vm0, %v892_v41, 0.0 }
 0x7fd   :  { %897 = vadd.xlane.f32.xlu1 %v896_v2 }
 0x868   :  { %v895_v0 = vpop.xlane.xlu0 %894 }
 0x869   :  { %v899_v15 = vmul.f32 %v895_v0, %v1421_v5 }
 0x86b   :  { %v901_v16 = vsub.f32 %v891_v9, %v899_v15 }
 0x86d   :  { %v903_v19 = vmul.f32 %v901_v16, %v901_v16 }
 0x86f   :  { %v905_v4 = vsel %vm76_vm0, %v903_v19, 0.0 }
 0x870   :  { %v898_v6 = vpop.xlane.xlu1 %897  ;;  %906 = vadd.xlane.f32.xlu2 %v905_v4 }
 0x871   :  { %v900_v20 = vmul.f32 %v898_v6, %v1421_v5 }
 0x873   :  { %v902_v22 = vsub.f32 %v892_v41, %v900_v20 }
 0x875   :  { %v904_v23 = vmul.f32 %v902_v22, %v902_v22 }
 0x877   :  { %v908_v24 = vsel %vm76_vm0, %v904_v23, 0.0 }
 0x878   :  { %909 = vadd.xlane.f32.xlu0 %v908_v24 }
 0x8e3   :  { %v907_v25 = vpop.xlane.xlu2 %906 }
 0x8e4   :  { %v911_v27 = vmul.f32 %v907_v25, %v1421_v5 }
 0x8e6   :  { %v913_v28 = vadd.f32 1e-05, %v911_v27 }
 0x8e8   :  { %1090 = vrsqrt.f32 %v913_v28  ;;  %vm921_vm3 = vweird.f32 %v913_v28 }
 0x8eb   :  { %v910_v52 = vpop.xlane.xlu0 %909 }
 0x8ec   :  { %v912_v29 = vmul.f32 %v910_v52, %v1421_v5 }
 0x8ee   :  { %v1091_v30 = vpop.eup %1090  ;;  %v914_v31 = vadd.f32 1e-05, %v912_v29 }
 0x8ef   :  { %v916_v32 = vmul.f32 %v1091_v30, %v913_v28  ;;  %vm922_vm15 = vweird.f32 %v1091_v30 }
 0x8f0   :  { %1092 = vrsqrt.f32 %v914_v31  ;;  %vm923_vm4 = vmor %vm921_vm3, %vm922_vm15  ;;  %vm931_vm6 = vweird.f32 %v914_v31 }
 0x8f1   :  { %v917_v33 = vmul.f32 %v1091_v30, %v916_v32 }
 0x8f3   :  { %v918_v34 = vmul.f32 0.5, %v917_v33 }
 0x8f5   :  { %v919_v35 = vsub.f32 1.5, %v918_v34 }
 0x8f6   :  { %v1093_v36 = vpop.eup %1092 }
 0x8f7   :  { %v920_v38 = vmul.f32 %v1091_v30, %v919_v35  ;;  %v926_v40 = vmul.f32 %v1093_v36, %v914_v31  ;;  %vm932_vm5 = vweird.f32 %v1093_v36 }
 0x8f8   :  { %vm933_vm7 = vmor %vm931_vm6, %vm932_vm5 }
 0x8f9   :  { %v924_v43 = vsel %vm923_vm4, %v1091_v30, %v920_v38  ;;  %v927_v44 = vmul.f32 %v1093_v36, %v926_v40 }
 0x8fa   :  { %v935_v45 = vmul.f32 %v924_v43, %v901_v16 }
 0x8fb   :  { %v928_v5 = vmul.f32 0.5, %v927_v44 }
 0x8fc   :  { %v938_v47 = vmul.f32 %v937_v42, %v935_v45 }
 0x8fd   :  { %v929_v48 = vsub.f32 1.5, %v928_v5 }
 0x8fe   :  { %v941_v11 = vadd.f32 %v940_v46, %v938_v47 }
 0x8ff   :  { %v930_v39 = vmul.f32 %v1093_v36, %v929_v48 }
 0x900   :  { %943 = vst.msk [vmem:[#allocation8] sm:$0xff] %vm76_vm0, %v941_v11 }
 0x901   :  { %v934_v49 = vsel %vm933_vm7, %v1093_v36, %v930_v39 }
 0x902   :  { %v936_v50 = vmul.f32 %v934_v49, %v902_v22 }
 0x904   :  { %v939_v51 = vmul.f32 %v937_v42, %v936_v50 }
 0x906   :  { %v942_v53 = vadd.f32 %v940_v46, %v939_v51 }
 0x908   :  { %944 = vst.msk [vmem:[#allocation8 + $0x8] sm:$0xff] %vm76_vm0, %v942_v53 }
 0x909   :  { %957 = dma.vmem_to_hbm [thread:$0]  %s950_s14, 256, %s952_s17, [#allocation4], %s1198_s20, %s1198_s20, %s1199_s21  }
 0x90a   :  { %1195 = dma.done.wait [#allocation4], 256  }
 0x90b   :  { %1196 = vsyncadd [#allocation4], 4294967040 }
 0x90c   :  { %962 = vsyncpa [#allocation3], 1 }
 0x90d   :  { %963 = vsyncpa [#allocation6], 1 }
 0x90e   :  { %964 = vsyncpa [#allocation4], 1 }

</bundles_post_ra>
